<compile_context>
chip_gen: v6e
topology: v6e:2x2x1
jax: 0.10.0
libtpu: 0.0.40
codegen_flags: <defaults>
</compile_context>

<pallas_src>
import jax
import jax.numpy as jnp
from jax.experimental import pallas as pl
from jax.experimental.pallas import tpu as pltpu


# Problem shape implied by Conv2d(3, 16, 3, stride=1, bias=True).
N, CIN, H, W = 2, 3, 16, 16
COUT, KH, KW = 16, 3, 3
OH, OW = H - KH + 1, W - KW + 1          # 14, 14 (stride=1, VALID padding)
HW = H * W                               # 256 lanes per image (multiple of 128)
XPAD = HW + 128                          # 384: room for tap offsets up to (KH-1)*W+(KW-1)=34
MPAD = N * HW                            # 512 lane-dense output columns
K = KH * KW * CIN                        # 27 (flattened (i, j, ci)-major)


def conv_relu_kernel(x_ref, w_ref, b_ref, o_ref, xp_ref, p_ref):
    # x_ref : (N*CIN, HW)   = (6, 256)   images, row (n*CIN + ci), lane (h*W + w)
    # w_ref : (COUT, K)     = (16, 27)   weight flattened (i, j, ci)-major
    # b_ref : (COUT, 1)
    # o_ref : (COUT, MPAD)  = (16, 512)  column = n*HW + oh*W + ow (padded, sliced in wrapper)
    # xp_ref: (N*CIN, XPAD)              zero-tail-padded copy of x (scratch)
    # p_ref : (K, MPAD)                  im2col patch slab (scratch)

    # Zero the pad tail, then copy x in, so every tap can read a full
    # 256-lane window without any wrap / out-of-bounds handling.
    xp_ref[:, pl.ds(HW, XPAD - HW)] = jnp.zeros(
        (x_ref.shape[0], XPAD - HW), x_ref.dtype)
    xp_ref[:, pl.ds(0, HW)] = x_ref[...]

    # In-kernel im2col: 9 static lane-shifted block copies build the slab.
    # p[(i*KW + j)*CIN + ci, n*HW + oh*W + ow] = x[n, ci, oh + i, ow + j]
    for i in range(KH):
        for j in range(KW):
            d = i * W + j
            blk = xp_ref[:, pl.ds(d, HW)]                     # (N*CIN, 256)
            base = (i * KW + j) * CIN
            for n in range(N):
                p_ref[pl.ds(base, CIN), pl.ds(n * HW, HW)] = (
                    blk[n * CIN:(n + 1) * CIN, :])

    # Single MXU matmul over all images + fused bias + ReLU epilogue.
    acc = jnp.dot(w_ref[...], p_ref[...],
                  preferred_element_type=jnp.float32)          # (16, 512)
    acc = acc + b_ref[...]                                     # bias broadcast, once
    o_ref[...] = jnp.maximum(acc, 0.0).astype(o_ref.dtype)     # lane-dense store


def conv2d_relu(x_nchw, weight_oihw, bias):
    """x: (N, Cin, H, W) f32; weight: (Cout, Cin, KH, KW); bias: (Cout,). Returns NCHW."""
    n, cin, h, w = x_nchw.shape
    cout, cin_w, kh, kw = weight_oihw.shape
    assert (n, cin, h, w) == (N, CIN, H, W)
    assert (cout, cin_w, kh, kw) == (COUT, CIN, KH, KW)

    x_flat = x_nchw.reshape(n * cin, h * w)                    # free row-major reshape
    # (i, j, ci)-major flattening to match the in-kernel patch row ordering.
    w2d = weight_oihw.transpose(0, 2, 3, 1).reshape(cout, kh * kw * cin)   # (16, 27)
    b2d = bias.reshape(cout, 1)

    vmem = pltpu.MemorySpace.VMEM
    out = pl.pallas_call(
        conv_relu_kernel,
        out_shape=jax.ShapeDtypeStruct((cout, MPAD), x_nchw.dtype),
        in_specs=[
            pl.BlockSpec(memory_space=vmem),   # images
            pl.BlockSpec(memory_space=vmem),   # weight
            pl.BlockSpec(memory_space=vmem),   # bias
        ],
        out_specs=pl.BlockSpec(memory_space=vmem),
        scratch_shapes=[
            pltpu.VMEM((n * cin, XPAD), x_nchw.dtype),         # padded image slab
            pltpu.VMEM((kh * kw * cin, MPAD), x_nchw.dtype),   # im2col patches
        ],
    )(x_flat, w2d, b2d)

    # (Cout, N*H*W) -> keep the valid 14x14 window -> NCHW. Tiny (~12.5 KB) fixup.
    out = out.reshape(cout, n, h, w)[:, :, :OH, :OW]
    return out.transpose(1, 0, 2, 3)


if __name__ == "__main__":
    key = jax.random.PRNGKey(0)
    k_x, k_w, k_b = jax.random.split(key, 3)

    x = jax.random.normal(k_x, (N, CIN, H, W), dtype=jnp.float32)
    fan_in = CIN * KH * KW
    bound = 1.0 / (fan_in ** 0.5)
    weight = jax.random.uniform(k_w, (COUT, CIN, KH, KW), jnp.float32,
                                minval=-bound, maxval=bound)
    bias = jax.random.uniform(k_b, (COUT,), jnp.float32,
                              minval=-bound, maxval=bound)

    out = jax.block_until_ready(conv2d_relu(x, weight, bias))

    # Reference: pure-JAX conv + bias + relu.
    ref = jax.lax.conv_general_dilated(
        x, weight, window_strides=(1, 1), padding="VALID",
        dimension_numbers=("NCHW", "OIHW", "NCHW"),
    ) + bias.reshape(1, COUT, 1, 1)
    ref = jnp.maximum(ref, 0.0)

    assert out.shape == (N, COUT, OH, OW), out.shape
    assert jnp.allclose(out, ref, atol=1e-5, rtol=1e-5), "mismatch vs reference"

    print("KERNEL_OK")
</pallas_src>

<mosaic_0001>
module attributes {stable_mosaic.version = 11 : i64} {
  func.func @conv_relu_kernel(%arg0: memref<6x256xf32, #tpu.memory_space<vmem>>, %arg1: memref<16x27xf32, #tpu.memory_space<vmem>>, %arg2: memref<16x1xf32, #tpu.memory_space<vmem>>, %arg3: memref<16x512xf32, #tpu.memory_space<vmem>>, %arg4: memref<6x384xf32, #tpu.memory_space<vmem>>, %arg5: memref<27x512xf32, #tpu.memory_space<vmem>>) attributes {dimension_semantics = [], scalar_prefetch = 0 : i64, scratch_operands = 2 : i64, tpu.core_type = #tpu.core_type<tc>} {
    %cst = arith.constant 0.000000e+00 : f32
    %0 = vector.broadcast %cst : f32 to vector<6x128xf32>
    %c0 = arith.constant 0 : index
    %c256 = arith.constant 256 : index
    %1 = vector.load %arg4[%c0, %c256] : memref<6x384xf32, #tpu.memory_space<vmem>>, vector<6x128xf32>
    tpu.vector_store %arg4[%c0, %c256], %0 {strides = array<i32>} : memref<6x384xf32, #tpu.memory_space<vmem>>, vector<6x128xf32>,
    %c0_0 = arith.constant 0 : index
    %c0_1 = arith.constant 0 : index
    %2 = vector.load %arg0[%c0_0, %c0_1] : memref<6x256xf32, #tpu.memory_space<vmem>>, vector<6x256xf32>
    %c0_2 = arith.constant 0 : index
    %c0_3 = arith.constant 0 : index
    %3 = vector.load %arg4[%c0_2, %c0_3] : memref<6x384xf32, #tpu.memory_space<vmem>>, vector<6x256xf32>
    tpu.vector_store %arg4[%c0_2, %c0_3], %2 {strides = array<i32>} : memref<6x384xf32, #tpu.memory_space<vmem>>, vector<6x256xf32>,
    %c0_4 = arith.constant 0 : index
    %c0_5 = arith.constant 0 : index
    %4 = vector.load %arg4[%c0_4, %c0_5] : memref<6x384xf32, #tpu.memory_space<vmem>>, vector<6x256xf32>
    %5 = vector.extract_strided_slice %4 {offsets = [0, 0], sizes = [3, 256], strides = [1, 1]} : vector<6x256xf32> to vector<3x256xf32>
    %c0_6 = arith.constant 0 : index
    %c0_7 = arith.constant 0 : index
    %6 = vector.load %arg5[%c0_6, %c0_7] : memref<27x512xf32, #tpu.memory_space<vmem>>, vector<3x256xf32>
    tpu.vector_store %arg5[%c0_6, %c0_7], %5 {strides = array<i32>} : memref<27x512xf32, #tpu.memory_space<vmem>>, vector<3x256xf32>,
    %7 = vector.extract_strided_slice %4 {offsets = [3, 0], sizes = [3, 256], strides = [1, 1]} : vector<6x256xf32> to vector<3x256xf32>
    %c0_8 = arith.constant 0 : index
    %c256_9 = arith.constant 256 : index
    %8 = vector.load %arg5[%c0_8, %c256_9] : memref<27x512xf32, #tpu.memory_space<vmem>>, vector<3x256xf32>
    tpu.vector_store %arg5[%c0_8, %c256_9], %7 {strides = array<i32>} : memref<27x512xf32, #tpu.memory_space<vmem>>, vector<3x256xf32>,
    %c0_10 = arith.constant 0 : index
    %c1 = arith.constant 1 : index
    %9 = vector.load %arg4[%c0_10, %c1] : memref<6x384xf32, #tpu.memory_space<vmem>>, vector<6x256xf32>
    %10 = vector.extract_strided_slice %9 {offsets = [0, 0], sizes = [3, 256], strides = [1, 1]} : vector<6x256xf32> to vector<3x256xf32>
    %c3 = arith.constant 3 : index
    %c0_11 = arith.constant 0 : index
    %11 = vector.load %arg5[%c3, %c0_11] : memref<27x512xf32, #tpu.memory_space<vmem>>, vector<3x256xf32>
    tpu.vector_store %arg5[%c3, %c0_11], %10 {strides = array<i32>} : memref<27x512xf32, #tpu.memory_space<vmem>>, vector<3x256xf32>,
    %12 = vector.extract_strided_slice %9 {offsets = [3, 0], sizes = [3, 256], strides = [1, 1]} : vector<6x256xf32> to vector<3x256xf32>
    %c3_12 = arith.constant 3 : index
    %c256_13 = arith.constant 256 : index
    %13 = vector.load %arg5[%c3_12, %c256_13] : memref<27x512xf32, #tpu.memory_space<vmem>>, vector<3x256xf32>
    tpu.vector_store %arg5[%c3_12, %c256_13], %12 {strides = array<i32>} : memref<27x512xf32, #tpu.memory_space<vmem>>, vector<3x256xf32>,
    %c0_14 = arith.constant 0 : index
    %c2 = arith.constant 2 : index
    %14 = vector.load %arg4[%c0_14, %c2] : memref<6x384xf32, #tpu.memory_space<vmem>>, vector<6x256xf32>
    %15 = vector.extract_strided_slice %14 {offsets = [0, 0], sizes = [3, 256], strides = [1, 1]} : vector<6x256xf32> to vector<3x256xf32>
    %c6 = arith.constant 6 : index
    %c0_15 = arith.constant 0 : index
    %16 = vector.load %arg5[%c6, %c0_15] : memref<27x512xf32, #tpu.memory_space<vmem>>, vector<3x256xf32>
    tpu.vector_store %arg5[%c6, %c0_15], %15 {strides = array<i32>} : memref<27x512xf32, #tpu.memory_space<vmem>>, vector<3x256xf32>,
    %17 = vector.extract_strided_slice %14 {offsets = [3, 0], sizes = [3, 256], strides = [1, 1]} : vector<6x256xf32> to vector<3x256xf32>
    %c6_16 = arith.constant 6 : index
    %c256_17 = arith.constant 256 : index
    %18 = vector.load %arg5[%c6_16, %c256_17] : memref<27x512xf32, #tpu.memory_space<vmem>>, vector<3x256xf32>
    tpu.vector_store %arg5[%c6_16, %c256_17], %17 {strides = array<i32>} : memref<27x512xf32, #tpu.memory_space<vmem>>, vector<3x256xf32>,
    %c0_18 = arith.constant 0 : index
    %c16 = arith.constant 16 : index
    %19 = vector.load %arg4[%c0_18, %c16] : memref<6x384xf32, #tpu.memory_space<vmem>>, vector<6x256xf32>
    %20 = vector.extract_strided_slice %19 {offsets = [0, 0], sizes = [3, 256], strides = [1, 1]} : vector<6x256xf32> to vector<3x256xf32>
    %c9 = arith.constant 9 : index
    %c0_19 = arith.constant 0 : index
    %21 = vector.load %arg5[%c9, %c0_19] : memref<27x512xf32, #tpu.memory_space<vmem>>, vector<3x256xf32>
    tpu.vector_store %arg5[%c9, %c0_19], %20 {strides = array<i32>} : memref<27x512xf32, #tpu.memory_space<vmem>>, vector<3x256xf32>,
    %22 = vector.extract_strided_slice %19 {offsets = [3, 0], sizes = [3, 256], strides = [1, 1]} : vector<6x256xf32> to vector<3x256xf32>
    %c9_20 = arith.constant 9 : index
    %c256_21 = arith.constant 256 : index
    %23 = vector.load %arg5[%c9_20, %c256_21] : memref<27x512xf32, #tpu.memory_space<vmem>>, vector<3x256xf32>
    tpu.vector_store %arg5[%c9_20, %c256_21], %22 {strides = array<i32>} : memref<27x512xf32, #tpu.memory_space<vmem>>, vector<3x256xf32>,
    %c0_22 = arith.constant 0 : index
    %c17 = arith.constant 17 : index
    %24 = vector.load %arg4[%c0_22, %c17] : memref<6x384xf32, #tpu.memory_space<vmem>>, vector<6x256xf32>
    %25 = vector.extract_strided_slice %24 {offsets = [0, 0], sizes = [3, 256], strides = [1, 1]} : vector<6x256xf32> to vector<3x256xf32>
    %c12 = arith.constant 12 : index
    %c0_23 = arith.constant 0 : index
    %26 = vector.load %arg5[%c12, %c0_23] : memref<27x512xf32, #tpu.memory_space<vmem>>, vector<3x256xf32>
    tpu.vector_store %arg5[%c12, %c0_23], %25 {strides = array<i32>} : memref<27x512xf32, #tpu.memory_space<vmem>>, vector<3x256xf32>,
    %27 = vector.extract_strided_slice %24 {offsets = [3, 0], sizes = [3, 256], strides = [1, 1]} : vector<6x256xf32> to vector<3x256xf32>
    %c12_24 = arith.constant 12 : index
    %c256_25 = arith.constant 256 : index
    %28 = vector.load %arg5[%c12_24, %c256_25] : memref<27x512xf32, #tpu.memory_space<vmem>>, vector<3x256xf32>
    tpu.vector_store %arg5[%c12_24, %c256_25], %27 {strides = array<i32>} : memref<27x512xf32, #tpu.memory_space<vmem>>, vector<3x256xf32>,
    %c0_26 = arith.constant 0 : index
    %c18 = arith.constant 18 : index
    %29 = vector.load %arg4[%c0_26, %c18] : memref<6x384xf32, #tpu.memory_space<vmem>>, vector<6x256xf32>
    %30 = vector.extract_strided_slice %29 {offsets = [0, 0], sizes = [3, 256], strides = [1, 1]} : vector<6x256xf32> to vector<3x256xf32>
    %c15 = arith.constant 15 : index
    %c0_27 = arith.constant 0 : index
    %31 = vector.load %arg5[%c15, %c0_27] : memref<27x512xf32, #tpu.memory_space<vmem>>, vector<3x256xf32>
    tpu.vector_store %arg5[%c15, %c0_27], %30 {strides = array<i32>} : memref<27x512xf32, #tpu.memory_space<vmem>>, vector<3x256xf32>,
    %32 = vector.extract_strided_slice %29 {offsets = [3, 0], sizes = [3, 256], strides = [1, 1]} : vector<6x256xf32> to vector<3x256xf32>
    %c15_28 = arith.constant 15 : index
    %c256_29 = arith.constant 256 : index
    %33 = vector.load %arg5[%c15_28, %c256_29] : memref<27x512xf32, #tpu.memory_space<vmem>>, vector<3x256xf32>
    tpu.vector_store %arg5[%c15_28, %c256_29], %32 {strides = array<i32>} : memref<27x512xf32, #tpu.memory_space<vmem>>, vector<3x256xf32>,
    %c0_30 = arith.constant 0 : index
    %c32 = arith.constant 32 : index
    %34 = vector.load %arg4[%c0_30, %c32] : memref<6x384xf32, #tpu.memory_space<vmem>>, vector<6x256xf32>
    %35 = vector.extract_strided_slice %34 {offsets = [0, 0], sizes = [3, 256], strides = [1, 1]} : vector<6x256xf32> to vector<3x256xf32>
    %c18_31 = arith.constant 18 : index
    %c0_32 = arith.constant 0 : index
    %36 = vector.load %arg5[%c18_31, %c0_32] : memref<27x512xf32, #tpu.memory_space<vmem>>, vector<3x256xf32>
    tpu.vector_store %arg5[%c18_31, %c0_32], %35 {strides = array<i32>} : memref<27x512xf32, #tpu.memory_space<vmem>>, vector<3x256xf32>,
    %37 = vector.extract_strided_slice %34 {offsets = [3, 0], sizes = [3, 256], strides = [1, 1]} : vector<6x256xf32> to vector<3x256xf32>
    %c18_33 = arith.constant 18 : index
    %c256_34 = arith.constant 256 : index
    %38 = vector.load %arg5[%c18_33, %c256_34] : memref<27x512xf32, #tpu.memory_space<vmem>>, vector<3x256xf32>
    tpu.vector_store %arg5[%c18_33, %c256_34], %37 {strides = array<i32>} : memref<27x512xf32, #tpu.memory_space<vmem>>, vector<3x256xf32>,
    %c0_35 = arith.constant 0 : index
    %c33 = arith.constant 33 : index
    %39 = vector.load %arg4[%c0_35, %c33] : memref<6x384xf32, #tpu.memory_space<vmem>>, vector<6x256xf32>
    %40 = vector.extract_strided_slice %39 {offsets = [0, 0], sizes = [3, 256], strides = [1, 1]} : vector<6x256xf32> to vector<3x256xf32>
    %c21 = arith.constant 21 : index
    %c0_36 = arith.constant 0 : index
    %41 = vector.load %arg5[%c21, %c0_36] : memref<27x512xf32, #tpu.memory_space<vmem>>, vector<3x256xf32>
    tpu.vector_store %arg5[%c21, %c0_36], %40 {strides = array<i32>} : memref<27x512xf32, #tpu.memory_space<vmem>>, vector<3x256xf32>,
    %42 = vector.extract_strided_slice %39 {offsets = [3, 0], sizes = [3, 256], strides = [1, 1]} : vector<6x256xf32> to vector<3x256xf32>
    %c21_37 = arith.constant 21 : index
    %c256_38 = arith.constant 256 : index
    %43 = vector.load %arg5[%c21_37, %c256_38] : memref<27x512xf32, #tpu.memory_space<vmem>>, vector<3x256xf32>
    tpu.vector_store %arg5[%c21_37, %c256_38], %42 {strides = array<i32>} : memref<27x512xf32, #tpu.memory_space<vmem>>, vector<3x256xf32>,
    %c0_39 = arith.constant 0 : index
    %c34 = arith.constant 34 : index
    %44 = vector.load %arg4[%c0_39, %c34] : memref<6x384xf32, #tpu.memory_space<vmem>>, vector<6x256xf32>
    %45 = vector.extract_strided_slice %44 {offsets = [0, 0], sizes = [3, 256], strides = [1, 1]} : vector<6x256xf32> to vector<3x256xf32>
    %c24 = arith.constant 24 : index
    %c0_40 = arith.constant 0 : index
    %46 = vector.load %arg5[%c24, %c0_40] : memref<27x512xf32, #tpu.memory_space<vmem>>, vector<3x256xf32>
    tpu.vector_store %arg5[%c24, %c0_40], %45 {strides = array<i32>} : memref<27x512xf32, #tpu.memory_space<vmem>>, vector<3x256xf32>,
    %47 = vector.extract_strided_slice %44 {offsets = [3, 0], sizes = [3, 256], strides = [1, 1]} : vector<6x256xf32> to vector<3x256xf32>
    %c24_41 = arith.constant 24 : index
    %c256_42 = arith.constant 256 : index
    %48 = vector.load %arg5[%c24_41, %c256_42] : memref<27x512xf32, #tpu.memory_space<vmem>>, vector<3x256xf32>
    tpu.vector_store %arg5[%c24_41, %c256_42], %47 {strides = array<i32>} : memref<27x512xf32, #tpu.memory_space<vmem>>, vector<3x256xf32>,
    %c0_43 = arith.constant 0 : index
    %c0_44 = arith.constant 0 : index
    %49 = vector.load %arg1[%c0_43, %c0_44] : memref<16x27xf32, #tpu.memory_space<vmem>>, vector<16x27xf32>
    %c0_45 = arith.constant 0 : index
    %c0_46 = arith.constant 0 : index
    %50 = vector.load %arg5[%c0_45, %c0_46] : memref<27x512xf32, #tpu.memory_space<vmem>>, vector<27x512xf32>
    %cst_47 = arith.constant dense<0.000000e+00> : vector<16x512xf32>
    %51 = tpu.matmul %49, %50, %cst_47 {dimension_numbers = #tpu.dot_dimension_numbers<[1], [0], [0], [1], [0, 0, 1, 1], [], []>} : vector<16x27xf32>, vector<27x512xf32>, vector<16x512xf32> -> vector<16x512xf32>
    %c0_48 = arith.constant 0 : index
    %c0_49 = arith.constant 0 : index
    %52 = vector.load %arg2[%c0_48, %c0_49] : memref<16x1xf32, #tpu.memory_space<vmem>>, vector<16x1xf32>
    %53 = vector.broadcast %52 : vector<16x1xf32> to vector<16x512xf32>
    %54 = arith.addf %51, %53 : vector<16x512xf32>
    %cst_50 = arith.constant 0.000000e+00 : f32
    %55 = vector.broadcast %cst_50 : f32 to vector<16x512xf32>
    %56 = arith.maximumf %54, %55 : vector<16x512xf32>
    %c0_51 = arith.constant 0 : index
    %c0_52 = arith.constant 0 : index
    %57 = vector.load %arg3[%c0_51, %c0_52] : memref<16x512xf32, #tpu.memory_space<vmem>>, vector<16x512xf32>
    tpu.vector_store %arg3[%c0_51, %c0_52], %56 {strides = array<i32>} : memref<16x512xf32, #tpu.memory_space<vmem>>, vector<16x512xf32>,
    return
  }
}

</mosaic_0001>

<bundles_post_ra>
// kernel: tpu_custom_call.1
= control target key start
LH: loop header
LB: loop body
LE: loop exit
PB: predicated region body
PF: predicated region fallthrough
CT: control target
= control target key end

     0   :  { %8 = vsyncpa [#allocation5], 0  ;;  %s770_s0 = inlined_call_operand.vmem [shape: f32[6,256], index: 0, kind: input, shape index: {}]   ;;  %s771_s1 = inlined_call_operand.hbm [shape: f32[16,27], index: 1, kind: input, shape index: {}]   ;;  %s772_s2 = inlined_call_operand.vmem [shape: f32[16,1], index: 2, kind: input, shape index: {}]   ;;  %s773_s3 = inlined_call_operand.hbm [shape: f32[16,512], index: 3, kind: output, shape index: {}]  }
   0x1   :  { %9 = vsyncpa [#allocation6], 0  ;;  %s651_s12 = smov [#allocation4]  }
   0x2   :  { %s17_s13 = sshll.u32 %s651_s12, 4  ;;  %s18_s13 = int_to_ptr.vmem [resolvable:$true] %s17_s13 }
   0x3   :  { %s615_s14 = scalar_lea.vmem %s18_s13, 256  ;;  %p620_p1 = scmp.lt.s32.totalorder %s18_s13, %s18_s13 }
   0x4   :  { %p616_p0 = scmp.ne.s32.totalorder %s18_s13, %s615_s14  ;;  %p621_p2 = scmp.lt.s32.totalorder %s615_s14, %s615_s14 }
   0x6   :  { %p622_p3 = por %p621_p2, %p620_p1 }
   0x8   :  { %p623_p4 = pnand %p622_p3, %p616_p0 }
   0xa   :  { %626 = shalt.err (!%p623_p4)
}
   0xb   :  { %s652_s15 = smov 128   ;;  %s653_s16 = smov 8  }
   0xc   :  { %23 = dma.hbm_to_vmem [thread:$0]  %s771_s1, 256, %s18_s13, [#allocation5], %s652_s15, %s652_s15, %s653_s16  }
   0xd   :  { %647 = dma.done.wait [#allocation5], 256  }
   0xe   :  { %648 = vsyncadd [#allocation5], 4294967040  ;;  %v654_v0 = vmov 0.0   ;;  %v31_v1 = vld [vmem:[%s770_s0 + $0x8] sm:$0x3f]  ;;  %s655_s1 = smov 94  }
   0xf   :  { %29 = vst [vmem:[#allocation2 + $0x8] sm:$0x3f] %v654_v0  ;;  %535 = vmatprep.mubr.f32.mxu1 %v654_v0  ;;  %458 = vmatprep.mubr.f32.mxu0 %v654_v0  ;;  %v30_v2 = vld [vmem:[%s770_s0] sm:$0x3f]  ;;  %33 = vst [vmem:[#allocation2] sm:$0x3f] %v31_v1 }
  0x10   :  { %32 = vst [vmem:[#allocation2 + $0x10] sm:$0x3f] %v30_v2  ;;  %s656_s23 = smov 110   ;;  %s657_s0 = smov 96   ;;  %vm322_vm0 = vcmask 769024   ;;  %vm210_vm1 = vcmask 900096  }
  0x11   :  { %s658_s24 = smov 95   ;;  %s659_s25 = smov 126   ;;  %vm381_vm2 = vcmask 1042432   ;;  %vm251_vm3 = vcmask 785408   ;;  %vm288_vm4 = vcmask 777216   ;;  %vm95_vm5 = vcmask 1031168  }
  0x12   :  { %s660_s26 = smov 112   ;;  %s661_s27 = smov 111   ;;  %vm136_vm6 = vcmask 916480   ;;  %vm173_vm7 = vcmask 908288   ;;  %vm61_vm8 = vcmask 1039360   ;;  %vm374_vm9 = vcmask 220160  }
  0x13   :  { %s662_s28 = smov 127  }
  0x16   :  { %v312_v3 = vld [vmem:[#allocation2 + $0x8] sm:$0x3f]  ;;  %v311_v7 = vld [vmem:[#allocation2] sm:$0x3f] }
  0x17   :  { %v197_v4 = vld [vmem:[#allocation2 + $0x8] sm:$0x3f]  ;;  %v331_v5 = vrot.slane %v312_v3, 3  ;;  %320 = vrot.lane.b32.xlu0 %v312_v3, %s655_s1  ;;  %v310_v9 = vld [vmem:[#allocation2 + $0x10] sm:$0x3f]  ;;  %v330_v11 = vrot.slane %v311_v7, 3 }
  0x18   :  { %v203_v6 = vrot.slane %v197_v4, 1  ;;  %v221_v8 = vrot.slane %v197_v4, 4  ;;  %v196_v10 = vld [vmem:[#allocation2] sm:$0x3f]  ;;  %v329_v13 = vrot.slane %v310_v9, 3 }
  0x19   :  { %336 = vrot.lane.b32.xlu1 %v331_v5, %s655_s1  ;;  %v202_v12 = vrot.slane %v196_v10, 1  ;;  %v220_v14 = vrot.slane %v196_v10, 4  ;;  %v238_v15 = vld [vmem:[#allocation2 + $0x8] sm:$0x3f]  ;;  %v237_v16 = vld [vmem:[#allocation2] sm:$0x3f] }
  0x1a   :  { %v244_v17 = vrot.slane %v238_v15, 6  ;;  %v243_v18 = vrot.slane %v237_v16, 6  ;;  %v260_v19 = vrot.slane %v238_v15, 1  ;;  %v259_v20 = vrot.slane %v237_v16, 1  ;;  %v275_v21 = vld [vmem:[#allocation2 + $0x8] sm:$0x3f] }
  0x1b   :  { %318 = vrot.lane.b32.xlu0 %v311_v7, %s655_s1  ;;  %v274_v22 = vld [vmem:[#allocation2] sm:$0x3f]  ;;  %v281_v23 = vrot.slane %v275_v21, 3  ;;  %v297_v25 = vrot.slane %v275_v21, 6  ;;  %v195_v27 = vld [vmem:[#allocation2 + $0x10] sm:$0x3f] }
  0x1c   :  { %v280_v24 = vrot.slane %v274_v22, 3  ;;  %v296_v26 = vrot.slane %v274_v22, 6  ;;  %v219_v28 = vrot.slane %v195_v27, 4  ;;  %v201_v29 = vrot.slane %v195_v27, 1  ;;  %v236_v30 = vld [vmem:[#allocation2 + $0x10] sm:$0x3f] }
  0x1d   :  { %208 = vrot.lane.b32.xlu1 %v203_v6, %s656_s23  ;;  %v258_v31 = vrot.slane %v236_v30, 1  ;;  %v242_v32 = vrot.slane %v236_v30, 6  ;;  %v273_v33 = vld [vmem:[#allocation2 + $0x10] sm:$0x3f]  ;;  %v82_v36 = vld [vmem:[#allocation2 + $0x8] sm:$0x3f] }
  0x1e   :  { %v295_v34 = vrot.slane %v273_v33, 6  ;;  %v279_v35 = vrot.slane %v273_v33, 3  ;;  %v81_v37 = vld [vmem:[#allocation2] sm:$0x3f]  ;;  %v88_v38 = vrot.slane %v82_v36, 2  ;;  %v106_v40 = vrot.slane %v82_v36, 5 }
  0x1f   :  { %316 = vrot.lane.b32.xlu0 %v310_v9, %s655_s1  ;;  %v87_v39 = vrot.slane %v81_v37, 2  ;;  %v105_v41 = vrot.slane %v81_v37, 5  ;;  %v123_v42 = vld [vmem:[#allocation2 + $0x8] sm:$0x3f]  ;;  %v122_v43 = vld [vmem:[#allocation2] sm:$0x3f] }
  0x20   :  { %v129_v44 = vrot.slane %v123_v42, 7  ;;  %v128_v45 = vrot.slane %v122_v43, 7  ;;  %v145_v46 = vrot.slane %v123_v42, 2  ;;  %v144_v47 = vrot.slane %v122_v43, 2  ;;  %v160_v48 = vld [vmem:[#allocation2 + $0x8] sm:$0x3f] }
  0x21   :  { %226 = vrot.lane.b32.xlu1 %v221_v8, %s656_s23  ;;  %v159_v49 = vld [vmem:[#allocation2] sm:$0x3f]  ;;  %v166_v50 = vrot.slane %v160_v48, 4  ;;  %v182_v52 = vrot.slane %v160_v48, 7  ;;  %v80_v54 = vld [vmem:[#allocation2 + $0x10] sm:$0x3f] }
  0x22   :  { %v165_v51 = vrot.slane %v159_v49, 4  ;;  %v181_v53 = vrot.slane %v159_v49, 7  ;;  %v104_v55 = vrot.slane %v80_v54, 5  ;;  %v86_v56 = vrot.slane %v80_v54, 2  ;;  %v121_v57 = vld [vmem:[#allocation2 + $0x10] sm:$0x3f] }
  0x23   :  { %206 = vrot.lane.b32.xlu0 %v202_v12, %s656_s23  ;;  %v143_v58 = vrot.slane %v121_v57, 2  ;;  %v35_v59 = vld [vmem:[#allocation2] sm:$0x3f]  ;;  %v127_v60 = vrot.slane %v121_v57, 7  ;;  %v158_v61 = vld [vmem:[#allocation2 + $0x10] sm:$0x3f] }
  0x24   :  { %37 = vst [vmem:[#allocation3 + $0x8] sm:$0x7] %v35_v59  ;;  %v41_v62 = vrot.slane %v35_v59, 3  ;;  %v180_v63 = vrot.slane %v158_v61, 7  ;;  %v164_v1 = vrot.slane %v158_v61, 4  ;;  %v362_v10 = vld [vmem:[%s772_s2] sm:$0xff] }
  0x25   :  { %334 = vrot.lane.b32.xlu1 %v330_v11, %s655_s1  ;;  %v48_v2 = vld [vmem:[#allocation2 + $0x8] sm:$0x3f]  ;;  %v34_v3 = vld [vmem:[#allocation2 + $0x10] sm:$0x3f]  ;;  %v47_v4 = vld [vmem:[#allocation2] sm:$0x3f] }
  0x26   :  { %45 = vst [vmem:[#allocation3 + $0x58] sm:$0x7] %v41_v62  ;;  %v40_v5 = vrot.slane %v34_v3, 3  ;;  %36 = vst [vmem:[#allocation3 + $0x48] sm:$0x7] %v34_v3  ;;  %v54_v6 = vrot.slane %v48_v2, 5 }
  0x27   :  { %224 = vrot.lane.b32.xlu0 %v220_v14, %s656_s23  ;;  %v53_v7 = vrot.slane %v47_v4, 5  ;;  %v46_v8 = vld [vmem:[#allocation2 + $0x10] sm:$0x3f]  ;;  %v363_v11 = vld [vmem:[%s772_s2 + $0x8] sm:$0xff]  ;;  %v663_v12 = vmov 0   ;;  %s664_s2 = smov [#allocation7]  }
  0x28   :  { %44 = vst [vmem:[#allocation3 + $0x40] sm:$0x7] %v40_v5  ;;  %v52_v9 = vrot.slane %v46_v8, 5  ;;  %605 = vset.pattern.permute.xlu0 %v663_v12  ;;  %606 = vset.pattern.permute.xlu1 %v663_v12  ;;  %s569_s6 = sshll.u32 %s664_s2, 4  ;;  %s570_s6 = int_to_ptr.vmem [resolvable:$true] %s569_s6 }
  0x29   :  { %332 = vrot.lane.b32.xlu1 %v329_v13, %s655_s1  ;;  %s627_s7 = scalar_lea.vmem %s570_s6, 1024  ;;  %p632_p6 = scmp.lt.s32.totalorder %s570_s6, %s570_s6 }
  0x2a   :  { %p628_p5 = scmp.ne.s32.totalorder %s570_s6, %s627_s7  ;;  %p633_p7 = scmp.lt.s32.totalorder %s627_s7, %s627_s7 }
  0x2b   :  { %247 = vrot.lane.b32.xlu0 %v243_v18, %s657_s0 }
  0x2c   :  { %p634_p8 = por %p633_p7, %p632_p6 }
  0x2d   :  { %249 = vrot.lane.b32.xlu1 %v244_v17, %s657_s0 }
  0x2e   :  { %p635_p9 = pnand %p634_p8, %p628_p5 }
  0x2f   :  { %263 = vrot.lane.b32.xlu0 %v259_v20, %s657_s0 }
  0x31   :  { %265 = vrot.lane.b32.xlu1 %v260_v19, %s657_s0 }
  0x33   :  { %284 = vrot.lane.b32.xlu0 %v280_v24, %s658_s24 }
  0x35   :  { %286 = vrot.lane.b32.xlu1 %v281_v23, %s658_s24 }
  0x37   :  { %300 = vrot.lane.b32.xlu0 %v296_v26, %s658_s24 }
  0x39   :  { %302 = vrot.lane.b32.xlu1 %v297_v25, %s658_s24 }
  0x3b   :  { %204 = vrot.lane.b32.xlu0 %v201_v29, %s656_s23 }
  0x3d   :  { %222 = vrot.lane.b32.xlu1 %v219_v28, %s656_s23 }
  0x3f   :  { %245 = vrot.lane.b32.xlu0 %v242_v32, %s657_s0 }
  0x41   :  { %261 = vrot.lane.b32.xlu1 %v258_v31, %s657_s0 }
  0x43   :  { %282 = vrot.lane.b32.xlu0 %v279_v35, %s658_s24 }
  0x45   :  { %298 = vrot.lane.b32.xlu1 %v295_v34, %s658_s24 }
  0x47   :  { %91 = vrot.lane.b32.xlu0 %v87_v39, %s659_s25 }
  0x49   :  { %93 = vrot.lane.b32.xlu1 %v88_v38, %s659_s25 }
  0x4b   :  { %109 = vrot.lane.b32.xlu0 %v105_v41, %s659_s25 }
  0x4d   :  { %111 = vrot.lane.b32.xlu1 %v106_v40, %s659_s25 }
  0x4f   :  { %132 = vrot.lane.b32.xlu0 %v128_v45, %s660_s26 }
  0x51   :  { %134 = vrot.lane.b32.xlu1 %v129_v44, %s660_s26 }
  0x53   :  { %148 = vrot.lane.b32.xlu0 %v144_v47, %s660_s26 }
  0x55   :  { %150 = vrot.lane.b32.xlu1 %v145_v46, %s660_s26 }
  0x57   :  { %169 = vrot.lane.b32.xlu0 %v165_v51, %s661_s27 }
  0x59   :  { %171 = vrot.lane.b32.xlu1 %v166_v50, %s661_s27 }
  0x5b   :  { %185 = vrot.lane.b32.xlu0 %v181_v53, %s661_s27 }
  0x5d   :  { %187 = vrot.lane.b32.xlu1 %v182_v52, %s661_s27 }
  0x5f   :  { %89 = vrot.lane.b32.xlu0 %v86_v56, %s659_s25 }
  0x61   :  { %107 = vrot.lane.b32.xlu1 %v104_v55, %s659_s25 }
  0x63   :  { %130 = vrot.lane.b32.xlu0 %v127_v60, %s660_s26 }
  0x65   :  { %146 = vrot.lane.b32.xlu1 %v143_v58, %s660_s26 }
  0x67   :  { %167 = vrot.lane.b32.xlu0 %v164_v1, %s661_s27 }
  0x69   :  { %183 = vrot.lane.b32.xlu1 %v180_v63, %s661_s27 }
  0x6b   :  { %57 = vrot.lane.b32.xlu0 %v53_v7, %s662_s28 }
  0x6d   :  { %59 = vrot.lane.b32.xlu1 %v54_v6, %s662_s28 }
  0x6f   :  { %70 = vrot.lane.b32.xlu0 %v47_v4, %s662_s28 }
  0x71   :  { %72 = vrot.lane.b32.xlu1 %v48_v2, %s662_s28 }
  0x73   :  { %55 = vrot.lane.b32.xlu0 %v52_v9, %s662_s28 }
  0x75   :  { %68 = vrot.lane.b32.xlu1 %v46_v8, %s662_s28 }
  0x77   :  { %366 = vperm.xlu0 %605, %v362_v10  }
  0x79   :  { %371 = vperm.xlu1 %606, %v363_v11  }
  0x89   :  { %v321_v13 = vpop.permute.xlu0 %320 }
  0x8b   :  { %v337_v14 = vpop.permute.xlu1 %336 }
  0x8d   :  { %v319_v16 = vpop.permute.xlu0 %318 }
  0x8e   :  { %v324_v17 = vsel %vm322_vm0, %v319_v16, %v321_v13 }
  0x8f   :  { %v209_v15 = vpop.permute.xlu1 %208  ;;  %328 = vst [vmem:[#allocation3] sm:$0x7] %v324_v17 }
  0x91   :  { %v317_v19 = vpop.permute.xlu0 %316 }
  0x92   :  { %v323_v20 = vsel %vm322_vm0, %v317_v19, %v319_v16 }
  0x93   :  { %v227_v18 = vpop.permute.xlu1 %226  ;;  %327 = vst [vmem:[#allocation3 + $0x60] sm:$0x7] %v323_v20 }
  0x95   :  { %v207_v23 = vpop.permute.xlu0 %206 }
  0x96   :  { %v212_v24 = vsel %vm210_vm1, %v207_v23, %v209_v15  ;;  %v359_v25 = vld [vmem:[#allocation3] sm:$0x7] }
  0x97   :  { %v335_v21 = vpop.permute.xlu1 %334  ;;  %216 = vst [vmem:[#allocation3 + $0x30] ss:$12 sps:$4 sm:$0x83] %v212_v24   ;;  %581 = vmatprep.subr.msk.mxu0 %vm381_vm2, %v359_v25 }
  0x98   :  { %v339_v22 = vsel %vm322_vm0, %v335_v21, %v337_v14 }
  0x99   :  { %343 = vst [vmem:[#allocation3 + $0x50] sm:$0x7] %v339_v22  ;;  %v225_v28 = vpop.permute.xlu0 %224 }
  0x9a   :  { %v229_v29 = vsel %vm210_vm1, %v225_v28, %v227_v18  ;;  %v358_v30 = vld [vmem:[#allocation3 + $0x60] sm:$0x7] }
  0x9b   :  { %v333_v26 = vpop.permute.xlu1 %332  ;;  %233 = vst [vmem:[#allocation3 + $0x28] ss:$84 sps:$4 sm:$0x83] %v229_v29   ;;  %582 = vmatpush1.msk.msra.mxu0 %vm381_vm2, %v358_v30 }
  0x9c   :  { %v338_v27 = vsel %vm322_vm0, %v333_v26, %v335_v21 }
  0x9d   :  { %342 = vst [vmem:[#allocation3 + $0x18] sm:$0x7] %v338_v27  ;;  %v248_v32 = vpop.permute.xlu0 %247 }
  0x9f   :  { %v250_v31 = vpop.permute.xlu1 %249 }
  0xa0   :  { %v361_v33 = vld [vmem:[#allocation3 + $0x50] sm:$0x7]  ;;  %v253_v34 = vsel %vm251_vm3, %v248_v32, %v250_v31 }
  0xa1   :  { %585 = vmatprep.subr.msk.mxu1 %vm381_vm2, %v361_v33  ;;  %257 = vst [vmem:[#allocation3 + $0x30] sm:$0x1c] %v253_v34  ;;  %v264_v36 = vpop.permute.xlu0 %263 }
  0xa3   :  { %v266_v35 = vpop.permute.xlu1 %265 }
  0xa4   :  { %v360_v37 = vld [vmem:[#allocation3 + $0x18] sm:$0x7]  ;;  %v268_v38 = vsel %vm251_vm3, %v264_v36, %v266_v35 }
  0xa5   :  { %586 = vmatpush1.msk.msra.mxu1 %vm381_vm2, %v360_v37  ;;  %272 = vst [vmem:[#allocation3 + $0x28] sm:$0x1c] %v268_v38  ;;  %v285_v40 = vpop.permute.xlu0 %284 }
  0xa7   :  { %v287_v39 = vpop.permute.xlu1 %286 }
  0xa8   :  { %v290_v41 = vsel %vm288_vm4, %v285_v40, %v287_v39 }
  0xa9   :  { %294 = vst [vmem:[#allocation3 + $0x30] sm:$0xe0] %v290_v41  ;;  %v301_v43 = vpop.permute.xlu0 %300 }
  0xab   :  { %v303_v42 = vpop.permute.xlu1 %302 }
  0xac   :  { %v305_v44 = vsel %vm288_vm4, %v301_v43, %v303_v42 }
  0xad   :  { %309 = vst [vmem:[#allocation3 + $0x28] sm:$0xe0] %v305_v44  ;;  %v205_v47 = vpop.permute.xlu0 %204  ;;  %v344_v44 = vld [vmem:[#allocation4] sm:$0xff] }
  0xae   :  { %v211_v48 = vsel %vm210_vm1, %v205_v47, %v207_v23  ;;  %v345_v47 = vld [vmem:[#allocation4 + $0x8] sm:$0xff] }
  0xaf   :  { %v223_v45 = vpop.permute.xlu1 %222  ;;  %215 = vst [vmem:[#allocation3 + $0x10] ss:$20 sps:$4 sm:$0x83] %v211_v48  }
  0xb0   :  { %v228_v46 = vsel %vm210_vm1, %v223_v45, %v225_v28  ;;  %v355_v49 = vld [vmem:[#allocation3 + $0x30] sm:$0xff] }
  0xb1   :  { %232 = vst [vmem:[#allocation3 + $0x68] ss:$12 sps:$4 sm:$0x83] %v228_v46   ;;  %420 = vmatprep.subr.mxu0 %v355_v49  ;;  %v246_v52 = vpop.permute.xlu0 %245 }
  0xb2   :  { %v252_v53 = vsel %vm251_vm3, %v246_v52, %v248_v32 }
  0xb3   :  { %v262_v50 = vpop.permute.xlu1 %261  ;;  %256 = vst [vmem:[#allocation3 + $0x10] sm:$0x1c] %v252_v53 }
  0xb4   :  { %v267_v51 = vsel %vm251_vm3, %v262_v50, %v264_v36  ;;  %v357_v54 = vld [vmem:[#allocation3 + $0x28] sm:$0xff] }
  0xb5   :  { %271 = vst [vmem:[#allocation3 + $0x68] sm:$0x1c] %v267_v51  ;;  %497 = vmatprep.subr.mxu1 %v357_v54  ;;  %v283_v57 = vpop.permute.xlu0 %282 }
  0xb6   :  { %v289_v58 = vsel %vm288_vm4, %v283_v57, %v285_v40 }
  0xb7   :  { %v299_v55 = vpop.permute.xlu1 %298  ;;  %293 = vst [vmem:[#allocation3 + $0x10] sm:$0xe0] %v289_v58 }
  0xb8   :  { %v304_v56 = vsel %vm288_vm4, %v299_v55, %v301_v43 }
  0xb9   :  { %308 = vst [vmem:[#allocation3 + $0x68] sm:$0xe0] %v304_v56  ;;  %v92_v60 = vpop.permute.xlu0 %91 }
  0xbb   :  { %v94_v59 = vpop.permute.xlu1 %93 }
  0xbc   :  { %v97_v61 = vsel %vm95_vm5, %v92_v60, %v94_v59 }
  0xbd   :  { %101 = vst [vmem:[#allocation3 + $0x38] ss:$-44 sps:$4 sm:$0xc1] %v97_v61   ;;  %v110_v63 = vpop.permute.xlu0 %109 }
  0xbe   :  { %v354_v3 = vld [vmem:[#allocation3 + $0x10] sm:$0xff] }
  0xbf   :  { %v112_v62 = vpop.permute.xlu1 %111  ;;  %421 = vmatpush1.msra.mxu0 %v354_v3 }
  0xc0   :  { %v356_v1 = vld [vmem:[#allocation3 + $0x68] sm:$0xff]  ;;  %v114_v2 = vsel %vm95_vm5, %v110_v63, %v112_v62 }
  0xc1   :  { %498 = vmatpush1.msra.mxu1 %v356_v1  ;;  %118 = vst [vmem:[#allocation3 + $0x78] ss:$-28 sps:$4 sm:$0xc1] %v114_v2   ;;  %v133_v5 = vpop.permute.xlu0 %132 }
  0xc3   :  { %v135_v4 = vpop.permute.xlu1 %134 }
  0xc4   :  { %v138_v6 = vsel %vm136_vm6, %v133_v5, %v135_v4 }
  0xc5   :  { %142 = vst [vmem:[#allocation3 + $0x38] sm:$0xe] %v138_v6  ;;  %v149_v8 = vpop.permute.xlu0 %148 }
  0xc7   :  { %v151_v7 = vpop.permute.xlu1 %150 }
  0xc8   :  { %v153_v9 = vsel %vm136_vm6, %v149_v8, %v151_v7 }
  0xc9   :  { %157 = vst [vmem:[#allocation3 + $0x78] sm:$0xe] %v153_v9  ;;  %v170_v11 = vpop.permute.xlu0 %169 }
  0xcb   :  { %v172_v10 = vpop.permute.xlu1 %171 }
  0xcc   :  { %v175_v12 = vsel %vm173_vm7, %v170_v11, %v172_v10 }
  0xcd   :  { %179 = vst [vmem:[#allocation3 + $0x38] sm:$0x70] %v175_v12  ;;  %v186_v14 = vpop.permute.xlu0 %185 }
  0xcf   :  { %v188_v13 = vpop.permute.xlu1 %187 }
  0xd0   :  { %v190_v15 = vsel %vm173_vm7, %v186_v14, %v188_v13 }
  0xd1   :  { %194 = vst [vmem:[#allocation3 + $0x78] sm:$0x70] %v190_v15  ;;  %v90_v18 = vpop.permute.xlu0 %89 }
  0xd2   :  { %v96_v19 = vsel %vm95_vm5, %v90_v18, %v92_v60 }
  0xd3   :  { %v108_v16 = vpop.permute.xlu1 %107  ;;  %100 = vst [vmem:[#allocation3 + $0x20] ss:$44 sps:$4 sm:$0xc1] %v96_v19  }
  0xd4   :  { %v113_v17 = vsel %vm95_vm5, %v108_v16, %v110_v63  ;;  %v351_v20 = vld [vmem:[#allocation3 + $0x38] sm:$0xff] }
  0xd5   :  { %117 = vst [vmem:[#allocation3 + $0x70] ss:$-44 sps:$4 sm:$0xc1] %v113_v17   ;;  %422 = vmatprep.subr.mxu0 %v351_v20  ;;  %v131_v23 = vpop.permute.xlu0 %130 }
  0xd6   :  { %v137_v24 = vsel %vm136_vm6, %v131_v23, %v133_v5 }
  0xd7   :  { %v147_v21 = vpop.permute.xlu1 %146  ;;  %141 = vst [vmem:[#allocation3 + $0x20] sm:$0xe] %v137_v24 }
  0xd8   :  { %v152_v22 = vsel %vm136_vm6, %v147_v21, %v149_v8  ;;  %v353_v25 = vld [vmem:[#allocation3 + $0x78] sm:$0xff] }
  0xd9   :  { %156 = vst [vmem:[#allocation3 + $0x70] sm:$0xe] %v152_v22  ;;  %499 = vmatprep.subr.mxu1 %v353_v25  ;;  %v168_v28 = vpop.permute.xlu0 %167 }
  0xda   :  { %v174_v29 = vsel %vm173_vm7, %v168_v28, %v170_v11 }
  0xdb   :  { %v184_v26 = vpop.permute.xlu1 %183  ;;  %178 = vst [vmem:[#allocation3 + $0x20] sm:$0x70] %v174_v29 }
  0xdc   :  { %v189_v27 = vsel %vm173_vm7, %v184_v26, %v186_v14 }
  0xdd   :  { %193 = vst [vmem:[#allocation3 + $0x70] sm:$0x70] %v189_v27  ;;  %v58_v31 = vpop.permute.xlu0 %57 }
  0xdf   :  { %v60_v30 = vpop.permute.xlu1 %59 }
  0xe0   :  { %v63_v32 = vsel %vm61_vm8, %v58_v31, %v60_v30 }
  0xe1   :  { %67 = vst [vmem:[#allocation3 + $0x8] sm:$0x38] %v63_v32  ;;  %v71_v34 = vpop.permute.xlu0 %70 }
  0xe2   :  { %v350_v37 = vld [vmem:[#allocation3 + $0x20] sm:$0xff] }
  0xe3   :  { %v73_v33 = vpop.permute.xlu1 %72  ;;  %423 = vmatpush1.msra.mxu0 %v350_v37 }
  0xe4   :  { %v352_v35 = vld [vmem:[#allocation3 + $0x70] sm:$0xff]  ;;  %v75_v36 = vsel %vm61_vm8, %v71_v34, %v73_v33 }
  0xe5   :  { %500 = vmatpush1.msra.mxu1 %v352_v35  ;;  %79 = vst [vmem:[#allocation3 + $0x58] sm:$0x38] %v75_v36  ;;  %v56_v40 = vpop.permute.xlu0 %55 }
  0xe6   :  { %v62_v41 = vsel %vm61_vm8, %v56_v40, %v58_v31 }
  0xe7   :  { %v69_v38 = vpop.permute.xlu1 %68  ;;  %66 = vst [vmem:[#allocation3 + $0x48] sm:$0x38] %v62_v41 }
  0xe8   :  { %v74_v39 = vsel %vm61_vm8, %v69_v38, %v71_v34  ;;  %v347_v42 = vld [vmem:[#allocation3 + $0x8] sm:$0xff] }
  0xe9   :  { %78 = vst [vmem:[#allocation3 + $0x40] sm:$0x38] %v74_v39  ;;  %424 = vmatprep.subr.mxu0 %v347_v42 }
  0xec   :  { %v349_v43 = vld [vmem:[#allocation3 + $0x58] sm:$0xff] }
  0xed   :  { %501 = vmatprep.subr.mxu1 %v349_v43 }
  0xee   :  { %v346_v46 = vld [vmem:[#allocation3 + $0x48] sm:$0xff] }
  0xef   :  { %425 = vmatpush1.msra.mxu0 %v346_v46 }
  0xf0   :  { %v348_v45 = vld [vmem:[#allocation3 + $0x40] sm:$0xff]  ;;  %583 = vmatmul.mubr.msk.f32.vlgmr.msra.gmra.mxu0 %vm374_vm9, %v344_v44 }
  0xf1   :  { %502 = vmatpush1.msra.mxu1 %v348_v45  ;;  %464 = vmatprep.mubr.f32.mxu0 %v654_v0 }
  0xf2   :  { %587 = vmatmul.mubr.msk.f32.vlgmr.msra.gmra.mxu1 %vm374_vm9, %v344_v44  ;;  %v367_v48 = vpop.permute.xlu0 %366 }
  0xf3   :  { %541 = vmatprep.mubr.f32.mxu1 %v654_v0 }
  0xf4   :  { %584 = vmatmul.mubr.msk.f32.gmra.mxu0 %vm374_vm9, %v345_v47  ;;  %v372_v54 = vpop.permute.xlu1 %371 }
  0xf6   :  { %588 = vmatmul.mubr.msk.f32.gmra.mxu1 %vm374_vm9, %v345_v47 }
 0x1b0   :  { %v460_v51 = vpop.f32.mrf.mxu0 }
 0x1b1   :  { %v461_v52 = vadd.f32 %v460_v51, %v367_v48 }
 0x1b2   :  { %v537_v49 = vpop.f32.mrf.mxu1  ;;  %v462_v57 = vpop.f32.mrf.mxu0 }
 0x1b3   :  { %v538_v50 = vadd.f32 %v537_v49, %v367_v48  ;;  %v548_v58 = vmax.f32 %v461_v52, 0.0  ;;  %v463_v59 = vadd.f32 %v462_v57, %v367_v48 }
 0x1b4   :  { %v539_v53 = vpop.f32.mrf.mxu1  ;;  %v466_v62 = vpop.f32.mrf.mxu0 }
 0x1b5   :  { %v550_v55 = vmax.f32 %v538_v50, 0.0  ;;  %v540_v56 = vadd.f32 %v539_v53, %v367_v48  ;;  %556 = vst [vmem:[#allocation7] sm:$0xff] %v548_v58  ;;  %v549_v0 = vmax.f32 %v463_v59, 0.0  ;;  %v467_v1 = vadd.f32 %v466_v62, %v372_v54 }
 0x1b6   :  { %v543_v60 = vpop.f32.mrf.mxu1  ;;  %v468_v5 = vpop.f32.mrf.mxu0 }
 0x1b7   :  { %558 = vst [vmem:[#allocation7 + $0x10] sm:$0xff] %v550_v55  ;;  %v551_v61 = vmax.f32 %v540_v56, 0.0  ;;  %v544_v63 = vadd.f32 %v543_v60, %v372_v54  ;;  %557 = vst [vmem:[#allocation7 + $0x8] sm:$0xff] %v549_v0  ;;  %v552_v6 = vmax.f32 %v467_v1, 0.0  ;;  %v469_v7 = vadd.f32 %v468_v5, %v372_v54 }
 0x1b8   :  { %v545_v2 = vpop.f32.mrf.mxu1 }
 0x1b9   :  { %559 = vst [vmem:[#allocation7 + $0x18] sm:$0xff] %v551_v61  ;;  %v554_v3 = vmax.f32 %v544_v63, 0.0  ;;  %v546_v4 = vadd.f32 %v545_v2, %v372_v54  ;;  %560 = vst [vmem:[#allocation7 + $0x20] sm:$0xff] %v552_v6  ;;  %v553_v9 = vmax.f32 %v469_v7, 0.0 }
 0x1bb   :  { %562 = vst [vmem:[#allocation7 + $0x30] sm:$0xff] %v554_v3  ;;  %v555_v8 = vmax.f32 %v546_v4, 0.0  ;;  %561 = vst [vmem:[#allocation7 + $0x28] sm:$0xff] %v553_v9 }
 0x1bd   :  { %563 = vst [vmem:[#allocation7 + $0x38] sm:$0xff] %v555_v8 }
 0x1be   :  { %638 = shalt.err (!%p635_p9)
}
 0x1bf   :  { %s665_s8 = smov 512   ;;  %s666_s9 = smov 32  }
 0x1c0   :  { %575 = dma.vmem_to_hbm [thread:$0]  %s570_s6, 1024, %s773_s3, [#allocation6], %s665_s8, %s665_s8, %s666_s9  }
 0x1c1   :  { %649 = dma.done.wait [#allocation6], 1024  }
 0x1c2   :  { %650 = vsyncadd [#allocation6], 4294966272 }
 0x1c3   :  { %579 = vsyncpa [#allocation5], 1 }
 0x1c4   :  { %580 = vsyncpa [#allocation6], 1 }

</bundles_post_ra>
